<compile_context>
chip_gen: v7x
topology: tpu7x:2x2x1
jax: 0.10.0
libtpu: 0.0.40
codegen_flags: <defaults>
</compile_context>

<pallas_src>
import functools

import jax
import jax.numpy as jnp
from jax.experimental import pallas as pl
from jax.experimental.pallas import tpu as pltpu


_LANE = 128
_MIB = 1024 * 1024


def _round_up(x, m):
    return -(-x // m) * m


def _hw_params():
    """Per-generation (tile_vmem_budget, vmem_limit_bytes, batch_tile_cap)."""
    try:
        kind = jax.devices()[0].device_kind.lower()
    except Exception:
        kind = ""
    if ("v4" in kind) or ("v5" in kind) or ("v6" in kind):
        # 128 MiB physical VMEM parts: use big tiles, raise scoped limit.
        return 48 * _MIB, 64 * _MIB, 512
    if ("v7" in kind) or ("tpu7" in kind):
        # 64 MiB per TensorCore: do NOT copy the 128-MiB plan.
        return 36 * _MIB, 48 * _MIB, 256
    if ("v2" in kind) or ("v3" in kind):
        return 8 * _MIB, 12 * _MIB, 128
    # Unknown generation: conservative numbers.
    return 20 * _MIB, 32 * _MIB, 256


def _tile_candidates(n):
    """Multiples of 128 that divide n (n itself a multiple of 128), descending."""
    return [m for m in range(n, 0, -_LANE) if n % m == 0]


def _footprint(tb, td, tv, x_item, w_item, with_acc):
    f = 2 * tb * td * x_item         # double-buffered x tiles (original dtype)
    f += 2 * td * tv * w_item        # double-buffered W tiles (storage dtype)
    f += 2 * tb * tv * 4             # double-buffered f32 output tiles
    f += (tb * td + td * tv) * 4     # in-kernel cast temporaries (upper bound)
    if with_acc:
        f += tb * tv * 4             # f32 accumulator scratch
    return f


def _plan_tiles(B, Dp, Vp, x_item, w_item, tb_cap, budget):
    """Pick (tb, td, tv, single_shot) using the ACTUAL call shapes."""
    if B <= tb_cap:
        tb_list = [B]                                  # one batch tile
    else:
        tb_list = [t for t in (512, 256, 128, 64, 32, 16, 8) if t <= tb_cap]
    tv_list = _tile_candidates(Vp)
    td_list = _tile_candidates(Dp)

    # Single-shot path (full D per step, no accumulator, W streamed exactly
    # once): prefer the largest tv (fewer x re-reads), then the largest tb.
    for tv in tv_list:
        for tb in tb_list:
            if _footprint(tb, Dp, tv, x_item, w_item, with_acc=False) <= budget:
                return tb, Dp, tv, True

    # Reduce path (D tiled, f32 accumulator): W is re-streamed once per batch
    # tile here, so prefer the largest tb, then tv, then td.
    for tb in tb_list:
        for tv in tv_list:
            for td in td_list:
                if _footprint(tb, td, tv, x_item, w_item, with_acc=True) <= budget:
                    return tb, td, tv, False

    # Last-resort minimum plan (always fits any sane budget).
    return tb_list[-1], td_list[-1], tv_list[-1], False


def _dot_kernel_single(x_ref, w_ref, o_ref, *, compute_dtype):
    # Full reduction in one MXU call: (tb, Dp) @ (Dp, tv) -> (tb, tv).
    x = x_ref[...].astype(compute_dtype)
    w = w_ref[...].astype(jnp.float32).astype(compute_dtype)   # int8 dequant path
    o_ref[...] = jnp.dot(x, w, preferred_element_type=jnp.float32).astype(o_ref.dtype)


def _dot_kernel_reduce(x_ref, w_ref, o_ref, acc_ref, *, compute_dtype):
    # grid = (Vp//tv, nb, Dp//td); reduction axis (D) innermost.
    # NOTE: in this path each W column-block is re-streamed once per batch tile.
    @pl.when(pl.program_id(2) == 0)
    def _():
        acc_ref[...] = jnp.zeros_like(acc_ref)

    x = x_ref[...].astype(compute_dtype)
    w = w_ref[...].astype(jnp.float32).astype(compute_dtype)
    acc_ref[...] += jnp.dot(x, w, preferred_element_type=jnp.float32)

    @pl.when(pl.program_id(2) == pl.num_programs(2) - 1)
    def _():
        o_ref[...] = acc_ref[...].astype(o_ref.dtype)


def hamming_map_reduce_dot(x, wt_padded, *, dim, num_vectors, compute_dtype,
                           budget, vmem_limit, tb_cap):
    """out[b, v] = sum_d x[b, d] * W[v, d]  with W stored pre-transposed/padded."""
    B, D = x.shape
    assert D == dim, "feature dims must match"
    Dp, Vp = wt_padded.shape

    # Zero-pad x along D only when D is not lane-aligned (zeros cannot change
    # the dot product).  No batch padding and no dtype cast here: the batch
    # edge is a partial grid tile, and the cast happens in-kernel.
    if Dp != D:
        x = jnp.pad(x, ((0, 0), (0, Dp - D)))

    x_item = jnp.dtype(x.dtype).itemsize
    w_item = jnp.dtype(wt_padded.dtype).itemsize
    tb, td, tv, single_shot = _plan_tiles(B, Dp, Vp, x_item, w_item, tb_cap, budget)

    nb = pl.cdiv(B, tb)
    nv = Vp // tv
    out_shape = jax.ShapeDtypeStruct((B, Vp), jnp.float32)

    if single_shot:
        kernel = functools.partial(_dot_kernel_single, compute_dtype=compute_dtype)
        out = pl.pallas_call(
            kernel,
            out_shape=out_shape,
            # Weight-tile axis outermost: each (Dp, tv) W tile is DMA'd once
            # and stays resident across every batch tile (its block index does
            # not change along the inner axis, so Pallas skips the re-copy).
            grid=(nv, nb),
            in_specs=[
                pl.BlockSpec((tb, Dp), lambda j, i: (i, 0)),   # x tile
                pl.BlockSpec((Dp, tv), lambda j, i: (0, j)),   # W^T tile
            ],
            out_specs=pl.BlockSpec((tb, tv), lambda j, i: (i, j)),
            compiler_params=pltpu.CompilerParams(
                dimension_semantics=("parallel", "parallel"),
                vmem_limit_bytes=vmem_limit,
            ),
        )(x, wt_padded)
    else:
        kernel = functools.partial(_dot_kernel_reduce, compute_dtype=compute_dtype)
        out = pl.pallas_call(
            kernel,
            out_shape=out_shape,
            grid=(nv, nb, Dp // td),
            in_specs=[
                pl.BlockSpec((tb, td), lambda j, i, k: (i, k)),   # x tile
                pl.BlockSpec((td, tv), lambda j, i, k: (k, j)),   # W^T tile
            ],
            out_specs=pl.BlockSpec((tb, tv), lambda j, i, k: (i, j)),
            scratch_shapes=[pltpu.VMEM((tb, tv), jnp.float32)],
            compiler_params=pltpu.CompilerParams(
                dimension_semantics=("parallel", "parallel", "arbitrary"),
                vmem_limit_bytes=vmem_limit,
            ),
        )(x, wt_padded)

    if Vp != num_vectors:
        out = out[:, :num_vectors]
    return out


class HammingDistancePallas:
    """Mirror of the PyTorch HammingDistance module (frozen weight)."""

    def __init__(self, vectors, binary_inputs=True):
        # nn.Parameter(vectors, requires_grad=False): just hold the array.
        # TODO(synk): the [1, 2] bit-slicing (SlicedData / SliceMethod) is an
        # analog-crossbar mapping detail with no numerical effect on the ideal
        # forward (a plain dot product); it is intentionally not re-implemented.
        w = jnp.asarray(vectors)
        self.num_vectors, self.dim = w.shape

        # Hamming weights are {0,1}: store them as int8 in HBM (4x less traffic
        # than f32) and dequantize in-kernel.  Fall back to exact f32 storage
        # for arbitrary (non-binary) weight values.
        weights_binary = bool(jnp.all((w == 0) | (w == 1)))
        store_dtype = jnp.int8 if weights_binary else jnp.float32

        # Compute dtype: bf16 MXU when both sides are {0,1} (exact: 0/1 are
        # bf16-exact and accumulation is f32); f32 otherwise so arbitrary
        # float inputs are never silently downcast.
        self.compute_dtype = (
            jnp.bfloat16 if (weights_binary and binary_inputs) else jnp.float32
        )

        wt = w.T.astype(store_dtype)                  # pre-transposed once: (D, V)
        dp = _round_up(self.dim, _LANE)               # minimal (<=127 elem) pad
        vp = _round_up(self.num_vectors, _LANE)
        if (dp, vp) != wt.shape:
            # Zero padding does not change the dot product of the valid region.
            wt = jnp.pad(wt, ((0, dp - self.dim), (0, vp - self.num_vectors)))
        self.wt = wt

        self.budget, self.vmem_limit, self.tb_cap = _hw_params()

    def __call__(self, x):
        # forward(engine, x) -> engine.MapReduceDot(x, slices, W_sliced.t) == x @ W.T
        return hamming_map_reduce_dot(
            x,
            self.wt,
            dim=self.dim,
            num_vectors=self.num_vectors,
            compute_dtype=self.compute_dtype,
            budget=self.budget,
            vmem_limit=self.vmem_limit,
            tb_cap=self.tb_cap,
        )


if __name__ == "__main__":
    key = jax.random.PRNGKey(0)
    kx, kw = jax.random.split(key)

    B, D, V = 8, 320, 200  # batch, vector dim, number of stored vectors

    # Binary vectors: the natural domain of a Hamming-distance module.
    x = jax.random.bernoulli(kx, 0.5, (B, D)).astype(jnp.float32)
    vectors = jax.random.bernoulli(kw, 0.5, (V, D)).astype(jnp.float32)

    module = HammingDistancePallas(vectors)
    out = module(x)
    out = jax.block_until_ready(out)

    # Reference check against plain JAX (exact for 0/1 inputs: 0/1 are
    # bf16-exact and the MXU accumulates in f32).
    ref = x @ vectors.T
    assert out.shape == (B, V)
    assert jnp.allclose(out, ref, atol=1e-5), "mismatch vs reference"

    print("KERNEL_OK")
</pallas_src>

<mosaic_0001>
module attributes {stable_mosaic.version = 11 : i64} {
  func.func @_dot_kernel_single(%arg0: i32, %arg1: i32, %arg2: memref<8x384xf32, #tpu.memory_space<vmem>>, %arg3: memref<384x256xi8, #tpu.memory_space<vmem>>, %arg4: memref<8x256xf32, #tpu.memory_space<vmem>>) attributes {dimension_semantics = [#tpu.dimension_semantics<parallel>, #tpu.dimension_semantics<parallel>], iteration_bounds = array<i64: 1, 1>, scalar_prefetch = 0 : i64, scratch_operands = 0 : i64, tpu.core_type = #tpu.core_type<tc>, window_params = [{transform_indices = @transform_0, window_bounds = array<i64: 8, 384>}, {transform_indices = @transform_1, window_bounds = array<i64: 384, 256>}, {transform_indices = @transform_2, window_bounds = array<i64: 8, 256>}]} {
    %c0 = arith.constant 0 : index
    %c0_0 = arith.constant 0 : index
    %0 = vector.load %arg2[%c0, %c0_0] : memref<8x384xf32, #tpu.memory_space<vmem>>, vector<8x384xf32>
    %1 = arith.truncf %0 : vector<8x384xf32> to vector<8x384xbf16>
    %c0_1 = arith.constant 0 : index
    %c0_2 = arith.constant 0 : index
    %2 = vector.load %arg3[%c0_1, %c0_2] : memref<384x256xi8, #tpu.memory_space<vmem>>, vector<384x256xi8>
    %3 = arith.sitofp %2 : vector<384x256xi8> to vector<384x256xf32>
    %4 = arith.truncf %3 : vector<384x256xf32> to vector<384x256xbf16>
    %cst = arith.constant dense<0.000000e+00> : vector<8x256xf32>
    %5 = tpu.matmul %1, %4, %cst {dimension_numbers = #tpu.dot_dimension_numbers<[1], [0], [0], [1], [0, 0, 1, 1], [], []>} : vector<8x384xbf16>, vector<384x256xbf16>, vector<8x256xf32> -> vector<8x256xf32>
    %c0_3 = arith.constant 0 : index
    %c0_4 = arith.constant 0 : index
    %6 = vector.load %arg4[%c0_3, %c0_4] : memref<8x256xf32, #tpu.memory_space<vmem>>, vector<8x256xf32>
    tpu.vector_store %arg4[%c0_3, %c0_4], %5 {strides = array<i32>} : memref<8x256xf32, #tpu.memory_space<vmem>>, vector<8x256xf32>,
    return
  }
  func.func @transform_0(%arg0: i32, %arg1: i32) -> (i32, i32) {
    %c0_i32 = arith.constant 0 : i32
    %c0_i32_0 = arith.constant 0 : i32
    return %arg1, %c0_i32 : i32, i32
  }
  func.func @transform_1(%arg0: i32, %arg1: i32) -> (i32, i32) {
    %c0_i32 = arith.constant 0 : i32
    %c0_i32_0 = arith.constant 0 : i32
    return %c0_i32, %arg0 : i32, i32
  }
  func.func @transform_2(%arg0: i32, %arg1: i32) -> (i32, i32) {
    %c0_i32 = arith.constant 0 : i32
    return %arg1, %arg0 : i32, i32
  }
}

</mosaic_0001>

<bundles_post_ra>
// kernel: tpu_custom_call.1
= control target key start
LH: loop header
LB: loop body
LE: loop exit
PB: predicated region body
PF: predicated region fallthrough
CT: control target
= control target key end

     0   :  { %7 = vsyncpa [#allocation3], 0  ;;  %s361_s0 = inlined_call_operand.hbm [shape: f32[8,384], index: 0, kind: input, shape index: {}]   ;;  %s362_s1 = inlined_call_operand.hbm [shape: s8[384,256], index: 1, kind: input, shape index: {}]   ;;  %s363_s2 = inlined_call_operand.hbm [shape: f32[8,256], index: 2, kind: output, shape index: {}]  }
   0x1   :  { %8 = vsyncpa [#allocation6], 0 }
   0x2   :  { %9 = vsyncpa [#allocation4], 0  ;;  %s297_s9 = smov [#allocation2]   ;;  %s298_s11 = smov [#allocation5]  }
   0x3   :  { %s16_s10 = sshll.u32 %s297_s9, 4  ;;  %s25_s12 = sshll.u32 %s298_s11, 4  ;;  %s17_s10 = int_to_ptr.vmem [resolvable:$true] %s16_s10  ;;  %s318_s12 = int_to_ptr.vmem [resolvable:$true] %s25_s12 }
   0x4   :  { %s225_s15 = scalar_lea.hbm %s361_s0, 384 }
   0x5   :  { %p226_p0 = scmp.ne.s32.totalorder %s361_s0, %s225_s15  ;;  %p229_p1 = scmp.lt.u32.totalorder %s225_s15, %s361_s0 }
   0x7   :  { %p231_p2 = pnand %p229_p1, %p226_p0 }
   0x9   :  { %234 = shalt.err (!%p231_p2)
}
   0xa   :  { %s235_s20 = scalar_lea.vmem %s17_s10, 384  ;;  %p240_p4 = scmp.lt.s32.totalorder %s17_s10, %s17_s10 }
   0xb   :  { %p236_p3 = scmp.ne.s32.totalorder %s17_s10, %s235_s20  ;;  %p241_p5 = scmp.lt.s32.totalorder %s235_s20, %s235_s20 }
   0xd   :  { %p242_p6 = por %p241_p5, %p240_p4 }
   0xf   :  { %p243_p7 = pnand %p242_p6, %p236_p3 }
  0x11   :  { %246 = shalt.err (!%p243_p7)
}
  0x12   :  { %19 = dma.hbm_to_vmem [thread:$0]  %s361_s0, 384, %s17_s10, [#allocation3]  }
  0x13   :  { %s247_s25 = scalar_lea.hbm %s362_s1, 3072 }
  0x14   :  { %p248_p8 = scmp.ne.s32.totalorder %s362_s1, %s247_s25  ;;  %p251_p9 = scmp.lt.u32.totalorder %s247_s25, %s362_s1 }
  0x16   :  { %p253_p10 = pnand %p251_p9, %p248_p8 }
  0x18   :  { %256 = shalt.err (!%p253_p10)
}
  0x19   :  { %s257_s30 = scalar_lea.vmem %s318_s12, 3072  ;;  %p262_p12 = scmp.lt.s32.totalorder %s318_s12, %s318_s12 }
  0x1a   :  { %p258_p11 = scmp.ne.s32.totalorder %s318_s12, %s257_s30  ;;  %p263_p13 = scmp.lt.s32.totalorder %s257_s30, %s257_s30 }
  0x1c   :  { %p264_p0 = por %p263_p13, %p262_p12 }
  0x1e   :  { %p265_p1 = pnand %p264_p0, %p258_p11 }
  0x20   :  { %268 = shalt.err (!%p265_p1)
}
  0x21   :  { %s299_s0 = smov 256   ;;  %s300_s3 = smov 16  }
  0x22   :  { %31 = dma.hbm_to_vmem [thread:$0]  %s362_s1, 3072, %s318_s12, [#allocation6], %s299_s0, %s299_s0, %s300_s3  }
  0x23   :  { %291 = dma.done.wait [#allocation3], 384  }
  0x24   :  { %292 = vsyncadd [#allocation3], 4294966912 }
  0x25   :  { %293 = dma.done.wait [#allocation6], 3072  }
  0x26   :  { %294 = vsyncadd [#allocation6], 4294964224  ;;  %v301_v0 = vmov 0   ;;  %v46_v1 = vld [vmem:[#allocation5 + $0x8] sm:$0xff]  ;;  %v45_v2 = vld [vmem:[#allocation5] sm:$0xff]  ;;  %s302_s1 = smov [#allocation7]  }
  0x27   :  { %190 = vmatprep.mubr.bf16.mxu0 %v301_v0  ;;  %v70_v3 = vunpack.c.l.s8.bf16 %v46_v1  ;;  %v72_v4 = vunpack.c.h.s8.bf16 %v46_v1  ;;  %v69_v5 = vunpack.c.l.s8.bf16 %v45_v2  ;;  %v48_v6 = vld [vmem:[#allocation5 + $0x18] sm:$0xff]  ;;  %v62_v7 = vld [vmem:[#allocation5 + $0x88] sm:$0xff]  ;;  %v61_v8 = vld [vmem:[#allocation5 + $0x80] sm:$0xff]  ;;  %v71_v9 = vunpack.c.h.s8.bf16 %v45_v2  ;;  %s207_s6 = sshll.u32 %s302_s1, 4  ;;  %s208_s6 = int_to_ptr.vmem [resolvable:$true] %s207_s6 }
  0x28   :  { %v74_v10 = vunpack.c.l.s8.bf16 %v48_v6  ;;  %v47_v11 = vld [vmem:[#allocation5 + $0x10] sm:$0xff]  ;;  %v102_v12 = vunpack.c.l.s8.bf16 %v62_v7  ;;  %v104_v13 = vunpack.c.h.s8.bf16 %v62_v7  ;;  %v101_v14 = vunpack.c.l.s8.bf16 %v61_v8  ;;  %v64_v15 = vld [vmem:[#allocation5 + $0x98] sm:$0xff]  ;;  %v50_v21 = vld [vmem:[#allocation5 + $0x28] sm:$0xff]  ;;  %s269_s7 = scalar_lea.vmem %s208_s6, 256  ;;  %p274_p3 = scmp.lt.s32.totalorder %s208_s6, %s208_s6 }
  0x29   :  { %117 = vmatprep.subr.bf16.mxu1 %v70_v3  ;;  %v73_v16 = vunpack.c.l.s8.bf16 %v47_v11  ;;  %v103_v17 = vunpack.c.h.s8.bf16 %v61_v8  ;;  %v76_v18 = vunpack.c.h.s8.bf16 %v48_v6  ;;  %v106_v19 = vunpack.c.l.s8.bf16 %v64_v15  ;;  %v63_v20 = vld [vmem:[#allocation5 + $0x90] sm:$0xff]  ;;  %v49_v26 = vld [vmem:[#allocation5 + $0x20] sm:$0xff]  ;;  %v66_v29 = vld [vmem:[#allocation5 + $0xa8] sm:$0xff]  ;;  %p270_p2 = scmp.ne.s32.totalorder %s208_s6, %s269_s7  ;;  %p275_p4 = scmp.lt.s32.totalorder %s269_s7, %s269_s7 }
  0x2a   :  { %118 = vmatpush1.bf16.msra.mxu1 %v69_v5  ;;  %158 = vmatprep.subr.bf16.mxu0 %v102_v12  ;;  %v40_v22 = vld [vmem:[#allocation2 + $0x8] sm:$0xff]  ;;  %v75_v23 = vunpack.c.h.s8.bf16 %v47_v11  ;;  %v105_v24 = vunpack.c.l.s8.bf16 %v63_v20  ;;  %v78_v25 = vunpack.c.l.s8.bf16 %v50_v21  ;;  %v108_v27 = vunpack.c.h.s8.bf16 %v64_v15  ;;  %v65_v34 = vld [vmem:[#allocation5 + $0xa0] sm:$0xff]  ;;  %v52_v35 = vld [vmem:[#allocation5 + $0x38] sm:$0xff] }
  0x2b   :  { %119 = vmatprep.subr.bf16.mxu1 %v72_v4  ;;  %159 = vmatpush1.bf16.msra.mxu0 %v101_v14  ;;  %v43_v28 = vpack.c.bf16 %v40_v22, %v40_v22  ;;  %v77_v30 = vunpack.c.l.s8.bf16 %v49_v26  ;;  %v107_v31 = vunpack.c.h.s8.bf16 %v63_v20  ;;  %v80_v32 = vunpack.c.h.s8.bf16 %v50_v21  ;;  %v51_v39 = vld [vmem:[#allocation5 + $0x30] sm:$0xff]  ;;  %v68_v41 = vld [vmem:[#allocation5 + $0xb8] sm:$0xff]  ;;  %v54_v47 = vld [vmem:[#allocation5 + $0x48] sm:$0xff]  ;;  %p276_p5 = por %p275_p4, %p274_p3 }
  0x2c   :  { %160 = vmatprep.subr.bf16.mxu0 %v104_v13  ;;  %v110_v33 = vunpack.c.l.s8.bf16 %v66_v29  ;;  %v79_v36 = vunpack.c.h.s8.bf16 %v49_v26  ;;  %v109_v37 = vunpack.c.l.s8.bf16 %v65_v34  ;;  %v82_v38 = vunpack.c.l.s8.bf16 %v52_v35  ;;  %v67_v46 = vld [vmem:[#allocation5 + $0xb0] sm:$0xff]  ;;  %v53_v51 = vld [vmem:[#allocation5 + $0x40] sm:$0xff]  ;;  %v41_v55 = vld [vmem:[#allocation2 + $0x10] sm:$0xff] }
  0x2d   :  { %149 = vmatprep.mubr.bf16.mxu1 %v43_v28  ;;  %v112_v40 = vunpack.c.h.s8.bf16 %v66_v29  ;;  %v81_v42 = vunpack.c.l.s8.bf16 %v51_v39  ;;  %v111_v43 = vunpack.c.h.s8.bf16 %v65_v34  ;;  %v84_v44 = vunpack.c.h.s8.bf16 %v52_v35  ;;  %v56_v57 = vld [vmem:[#allocation5 + $0x58] sm:$0xff]  ;;  %v55_v61 = vld [vmem:[#allocation5 + $0x50] sm:$0xff]  ;;  %v58_v0 = vld [vmem:[#allocation5 + $0x68] sm:$0xff]  ;;  %p277_p6 = pnand %p276_p5, %p270_p2 }
  0x2e   :  { %120 = vmatpush1.bf16.msra.mxu1 %v71_v9  ;;  %v114_v45 = vunpack.c.l.s8.bf16 %v68_v41  ;;  %v83_v48 = vunpack.c.h.s8.bf16 %v51_v39  ;;  %v113_v49 = vunpack.c.l.s8.bf16 %v67_v46  ;;  %v86_v50 = vunpack.c.l.s8.bf16 %v54_v47  ;;  %v57_v3 = vld [vmem:[#allocation5 + $0x60] sm:$0xff]  ;;  %v60_v6 = vld [vmem:[#allocation5 + $0x78] sm:$0xff]  ;;  %v59_v9 = vld [vmem:[#allocation5 + $0x70] sm:$0xff] }
  0x2f   :  { %121 = vmatprep.subr.bf16.mxu1 %v74_v10  ;;  %161 = vmatpush1.bf16.msra.mxu0 %v103_v17  ;;  %v116_v52 = vunpack.c.h.s8.bf16 %v68_v41  ;;  %v85_v53 = vunpack.c.l.s8.bf16 %v53_v51  ;;  %v115_v54 = vunpack.c.h.s8.bf16 %v67_v46  ;;  %v88_v56 = vunpack.c.h.s8.bf16 %v54_v47  ;;  %v39_v13 = vld [vmem:[#allocation2] sm:$0xff] }
  0x30   :  { %162 = vmatprep.subr.bf16.mxu0 %v106_v19  ;;  %v44_v58 = vpack.c.bf16 %v41_v55, %v41_v55  ;;  %v87_v59 = vunpack.c.h.s8.bf16 %v53_v51  ;;  %v90_v60 = vunpack.c.l.s8.bf16 %v56_v57  ;;  %v89_v62 = vunpack.c.l.s8.bf16 %v55_v61 }
  0x31   :  { %v92_v63 = vunpack.c.h.s8.bf16 %v56_v57  ;;  %v91_v1 = vunpack.c.h.s8.bf16 %v55_v61  ;;  %v94_v2 = vunpack.c.l.s8.bf16 %v58_v0  ;;  %v93_v4 = vunpack.c.l.s8.bf16 %v57_v3 }
  0x32   :  { %122 = vmatpush1.bf16.msra.mxu1 %v73_v16  ;;  %v96_v5 = vunpack.c.h.s8.bf16 %v58_v0  ;;  %v95_v7 = vunpack.c.h.s8.bf16 %v57_v3  ;;  %v98_v8 = vunpack.c.l.s8.bf16 %v60_v6  ;;  %v97_v10 = vunpack.c.l.s8.bf16 %v59_v9 }
  0x33   :  { %123 = vmatprep.subr.bf16.mxu1 %v76_v18  ;;  %163 = vmatpush1.bf16.msra.mxu0 %v105_v24  ;;  %v100_v11 = vunpack.c.h.s8.bf16 %v60_v6  ;;  %v99_v12 = vunpack.c.h.s8.bf16 %v59_v9  ;;  %v42_v14 = vpack.c.bf16 %v39_v13, %v39_v13 }
  0x34   :  { %164 = vmatprep.subr.bf16.mxu0 %v108_v27 }
  0x36   :  { %124 = vmatpush1.bf16.msra.mxu1 %v75_v23 }
  0x37   :  { %125 = vmatprep.subr.bf16.mxu1 %v78_v25  ;;  %165 = vmatpush1.bf16.msra.mxu0 %v107_v31 }
  0x38   :  { %166 = vmatprep.subr.bf16.mxu0 %v110_v33 }
  0x3a   :  { %126 = vmatpush1.bf16.msra.mxu1 %v77_v30 }
  0x3b   :  { %127 = vmatprep.subr.bf16.mxu1 %v80_v32  ;;  %167 = vmatpush1.bf16.msra.mxu0 %v109_v37 }
  0x3c   :  { %168 = vmatprep.subr.bf16.mxu0 %v112_v40 }
  0x3e   :  { %128 = vmatpush1.bf16.msra.mxu1 %v79_v36 }
  0x3f   :  { %129 = vmatprep.subr.bf16.mxu1 %v82_v38  ;;  %169 = vmatpush1.bf16.msra.mxu0 %v111_v43 }
  0x40   :  { %170 = vmatprep.subr.bf16.mxu0 %v114_v45 }
  0x42   :  { %130 = vmatpush1.bf16.msra.mxu1 %v81_v42 }
  0x43   :  { %131 = vmatprep.subr.bf16.mxu1 %v84_v44  ;;  %171 = vmatpush1.bf16.msra.mxu0 %v113_v49 }
  0x44   :  { %172 = vmatprep.subr.bf16.mxu0 %v116_v52 }
  0x46   :  { %132 = vmatpush1.bf16.msra.mxu1 %v83_v48 }
  0x47   :  { %133 = vmatprep.subr.bf16.mxu1 %v86_v50  ;;  %173 = vmatpush1.bf16.msra.mxu0 %v115_v54 }
  0x4a   :  { %134 = vmatpush1.bf16.msra.mxu1 %v85_v53  ;;  %191 = vmatmul.mubr.bf16.vlgmr.msra.gmra.mrb[0].mxu0 %v44_v58 }
  0x4b   :  { %135 = vmatprep.subr.bf16.mxu1 %v88_v56 }
  0x4e   :  { %136 = vmatpush1.bf16.msra.mxu1 %v87_v59 }
  0x4f   :  { %137 = vmatprep.subr.bf16.mxu1 %v90_v60 }
  0x52   :  { %138 = vmatpush1.bf16.msra.mxu1 %v89_v62 }
  0x53   :  { %139 = vmatprep.subr.bf16.mxu1 %v92_v63 }
  0x56   :  { %140 = vmatpush1.bf16.msra.mxu1 %v91_v1 }
  0x57   :  { %141 = vmatprep.subr.bf16.mxu1 %v94_v2 }
  0x5a   :  { %142 = vmatpush1.bf16.msra.mxu1 %v93_v4 }
  0x5b   :  { %143 = vmatprep.subr.bf16.mxu1 %v96_v5 }
  0x5e   :  { %144 = vmatpush1.bf16.msra.mxu1 %v95_v7 }
  0x5f   :  { %145 = vmatprep.subr.bf16.mxu1 %v98_v8 }
  0x62   :  { %146 = vmatpush1.bf16.msra.mxu1 %v97_v10 }
  0x63   :  { %147 = vmatprep.subr.bf16.mxu1 %v100_v11 }
  0x66   :  { %148 = vmatpush1.bf16.msra.mxu1 %v99_v12 }
  0x69   :  { %150 = vmatmul.mubr.bf16.vlgmr.msra.gmra.mrb[0].mxu1 %v42_v14 }
 0x11d   :  { %v192_v15 = vpop.f32.mrb[0].mxu0 }
 0x11e   :  { %v194_v16 = vpop.f32.mrb[1].mxu0 }
 0x11f   :  { %v196_v17 = vpop.f32.mrb[2].mxu0 }
 0x120   :  { %v197_v18 = vpop.f32.mrb[3].mxu0 }
 0x13c   :  { %v151_v19 = vpop.f32.mrb[0].mxu1 }
 0x13d   :  { %v193_v20 = vadd.f32 %v192_v15, %v151_v19  ;;  %v153_v21 = vpop.f32.mrb[1].mxu1 }
 0x13e   :  { %v195_v22 = vadd.f32 %v194_v16, %v153_v21  ;;  %v155_v23 = vpop.f32.mrb[2].mxu1 }
 0x13f   :  { %199 = vst [vmem:[#allocation7] sm:$0xff] %v193_v20  ;;  %v156_v24 = vpop.f32.mrb[3].mxu1 }
 0x140   :  { %200 = vst [vmem:[#allocation7 + $0x8] sm:$0xff] %v195_v22 }
 0x141   :  { %280 = shalt.err (!%p277_p6)
}
 0x142   :  { %s281_s10 = scalar_lea.hbm %s363_s2, 256 }
 0x143   :  { %p282_p7 = scmp.ne.s32.totalorder %s363_s2, %s281_s10  ;;  %p285_p8 = scmp.lt.u32.totalorder %s281_s10, %s363_s2 }
 0x145   :  { %p287_p9 = pnand %p285_p8, %p282_p7 }
 0x147   :  { %290 = shalt.err (!%p287_p9)
}
 0x148   :  { %210 = dma.vmem_to_hbm [thread:$0]  %s208_s6, 256, %s363_s2, [#allocation4]  }
 0x149   :  { %295 = dma.done.wait [#allocation4], 256  }
 0x14a   :  { %296 = vsyncadd [#allocation4], 4294967040 }
 0x14b   :  { %214 = vsyncpa [#allocation3], 1 }
 0x14c   :  { %215 = vsyncpa [#allocation6], 1 }
 0x14d   :  { %216 = vsyncpa [#allocation4], 1 }

</bundles_post_ra>
